<compile_context>
chip_gen: v6e
topology: v6e:2x2x1
jax: 0.10.0
libtpu: 0.0.40
codegen_flags: <defaults>
</compile_context>

<pallas_src>
import math
from functools import partial

import jax
import jax.numpy as jnp
from jax.experimental import pallas as pl
from jax.experimental.pallas import tpu as pltpu


# --------------------- tiled linear: (B, T, Din) @ (Din, Dout) + b ---------------------

def _linear_kernel(x_ref, w_ref, b_ref, o_ref):
    x = x_ref[0]                                                   # (t_blk, d_in)
    y = jnp.dot(x, w_ref[...], preferred_element_type=jnp.float32) # f32 accumulation
    y = y + b_ref[...]                                             # bias kept in f32
    o_ref[0] = y.astype(o_ref.dtype)


def _linear(x, w, b, *, out_dtype, t_blk, n_blk):
    """x: (B, T, d_in), w: (d_in, d_out), b: (1, d_out) -> (B, T, d_out)."""
    B, T, d_in = x.shape
    d_out = w.shape[-1]
    assert T % t_blk == 0 and d_out % n_blk == 0
    grid = (B, T // t_blk, d_out // n_blk)
    return pl.pallas_call(
        _linear_kernel,
        out_shape=jax.ShapeDtypeStruct((B, T, d_out), out_dtype),
        grid_spec=pltpu.PrefetchScalarGridSpec(
            num_scalar_prefetch=0,
            grid=grid,
            in_specs=[
                # x tile is invariant over the n axis -> fetched once per (b, t).
                pl.BlockSpec((1, t_blk, d_in), lambda b, t, n: (b, t, 0)),
                pl.BlockSpec((d_in, n_blk), lambda b, t, n: (0, n)),
                pl.BlockSpec((1, n_blk), lambda b, t, n: (0, n)),
            ],
            out_specs=pl.BlockSpec((1, t_blk, n_blk), lambda b, t, n: (b, t, n)),
        ),
        compiler_params=pltpu.CompilerParams(
            dimension_semantics=("parallel", "parallel", "arbitrary")),
    )(x, w, b)


# --------------------- flash attention: grid (B, T//tq, T//tk), head loop in-kernel ----

def _flash_attention_kernel(q_ref, k_ref, v_ref, o_ref, m_ref, l_ref, acc_ref, *,
                            num_heads, head_dim, approx_recip):
    j = pl.program_id(2)

    @pl.when(j == 0)
    def _():
        m_ref[...] = jnp.full_like(m_ref, -jnp.inf)
        l_ref[...] = jnp.zeros_like(l_ref)
        acc_ref[...] = jnp.zeros_like(acc_ref)

    q = q_ref[0]      # (tq, D) -- all heads, already scaled by 1/sqrt(head_dim)
    k = k_ref[0]      # (tk, D)
    v = v_ref[0]      # (tk, D)

    for h in range(num_heads):                       # static unroll over heads
        c0 = h * head_dim
        qh = q[:, c0:c0 + head_dim]                  # (tq, hd) lane-aligned slice
        kh = k[:, c0:c0 + head_dim]                  # (tk, hd)
        vh = v[:, c0:c0 + head_dim]                  # (tk, hd)

        # scores = qh @ kh^T without explicit transpose; f32 accumulation.
        s = jax.lax.dot_general(qh, kh, (((1,), (1,)), ((), ())),
                                preferred_element_type=jnp.float32)      # (tq, tk)

        m_prev = m_ref[h]                                                # (tq, 1)
        m_new = jnp.maximum(m_prev, jnp.max(s, axis=-1, keepdims=True))
        alpha = jnp.exp(m_prev - m_new)                                  # (tq, 1)
        p = jnp.exp(s - m_new)                                           # (tq, tk) f32

        l_ref[h] = alpha * l_ref[h] + jnp.sum(p, axis=-1, keepdims=True)
        pv = jnp.dot(p.astype(vh.dtype), vh,
                     preferred_element_type=jnp.float32)                 # (tq, hd)
        acc_ref[:, c0:c0 + head_dim] = alpha * acc_ref[:, c0:c0 + head_dim] + pv
        m_ref[h] = m_new

    @pl.when(j == pl.num_programs(2) - 1)
    def _():
        outs = []
        for h in range(num_heads):
            c0 = h * head_dim
            denom = l_ref[h]
            if approx_recip:
                inv = pl.reciprocal(denom, approx=True)    # EUP slot, nearly free
            else:
                inv = 1.0 / denom                          # exact path
            outs.append(acc_ref[:, c0:c0 + head_dim] * inv)
        # Single lane-dense (tq, D) store (full rows, unmasked wide vst).
        o_ref[0] = jnp.concatenate(outs, axis=-1).astype(o_ref.dtype)


def _attention(q_src, k_src, v_src, *, num_heads, head_dim, d_model, tq, tk,
               out_dtype, approx_recip, col_blocks):
    """q/k/v sources: (B, T, D) or the shared (B, T, 3D) fused projection.
    col_blocks gives the D-wide block-column index of Q/K/V inside each source."""
    B, T = q_src.shape[0], q_src.shape[1]
    qc, kc, vc = col_blocks
    kernel = partial(_flash_attention_kernel, num_heads=num_heads,
                     head_dim=head_dim, approx_recip=approx_recip)
    grid = (B, T // tq, T // tk)
    return pl.pallas_call(
        kernel,
        out_shape=jax.ShapeDtypeStruct((B, T, d_model), out_dtype),
        grid_spec=pltpu.PrefetchScalarGridSpec(
            num_scalar_prefetch=0,
            grid=grid,
            in_specs=[
                pl.BlockSpec((1, tq, d_model), lambda b, i, j, c=qc: (b, i, c)),
                pl.BlockSpec((1, tk, d_model), lambda b, i, j, c=kc: (b, j, c)),
                pl.BlockSpec((1, tk, d_model), lambda b, i, j, c=vc: (b, j, c)),
            ],
            out_specs=pl.BlockSpec((1, tq, d_model), lambda b, i, j: (b, i, 0)),
            scratch_shapes=[
                pltpu.VMEM((num_heads, tq, 1), jnp.float32),   # running max
                pltpu.VMEM((num_heads, tq, 1), jnp.float32),   # running denom
                pltpu.VMEM((tq, d_model), jnp.float32),        # unnormalized accumulator
            ],
        ),
        compiler_params=pltpu.CompilerParams(
            dimension_semantics=("parallel", "parallel", "arbitrary")),
    )(q_src, k_src, v_src)


# --------------------- parameter prepacking (done once, outside forward) ---------------

def prepare_params(params, *, num_heads, compute_dtype=jnp.bfloat16):
    D = params["wq"].shape[0]
    head_dim = D // num_heads
    scale = 1.0 / math.sqrt(head_dim)
    wq = params["wq"] * scale           # fold softmax scale into the Q projection
    bq = params["bq"] * scale
    return {
        "w_qkv": jnp.concatenate([wq, params["wk"], params["wv"]], axis=1).astype(compute_dtype),
        "b_qkv": jnp.concatenate([bq, params["bk"], params["bv"]])[None, :].astype(jnp.float32),
        "wq": wq.astype(compute_dtype), "bq": bq[None, :].astype(jnp.float32),
        "wk": params["wk"].astype(compute_dtype), "bk": params["bk"][None, :].astype(jnp.float32),
        "wv": params["wv"].astype(compute_dtype), "bv": params["bv"][None, :].astype(jnp.float32),
        "wo": params["wo"].astype(compute_dtype), "bo": params["bo"][None, :].astype(jnp.float32),
        "num_heads": num_heads, "compute_dtype": compute_dtype,
    }


# --------------------- forward ---------------------------------------------------------

def multi_head_self_attention(query, key, value, prepared):
    """query/key/value: (B, T, D) float32.  `prepared` comes from prepare_params()."""
    num_heads = prepared["num_heads"]
    cdt = prepared["compute_dtype"]
    B, T, D = query.shape
    assert D % num_heads == 0, "d_model must be divisible by num_heads"
    head_dim = D // num_heads
    assert head_dim % 128 == 0, "head_dim must be a multiple of 128 (lane alignment)"
    assert T % 128 == 0, "T must be a multiple of 128 (pad + mask ragged tails)"

    # Tile sizes (largest lane/sublane-aligned tiles that fit comfortably in VMEM).
    t_blk = 512 if T % 512 == 0 else (256 if T % 256 == 0 else 128)
    tq = 256 if T % 256 == 0 else 128
    tk = 256 if T % 256 == 0 else 128
    n_qkv = 512 if (3 * D) % 512 == 0 else (256 if (3 * D) % 256 == 0 else 128)
    n_out = 512 if D % 512 == 0 else (256 if D % 256 == 0 else 128)

    approx = cdt != jnp.float32
    xq = query.astype(cdt)

    if (query is key) and (key is value):
        # Self-attention fast path: one (t_blk, D) @ (D, 3D) matmul per tile, output (B, T, 3D).
        qkv = _linear(xq, prepared["w_qkv"], prepared["b_qkv"],
                      out_dtype=cdt, t_blk=t_blk, n_blk=n_qkv)
        attn = _attention(qkv, qkv, qkv, num_heads=num_heads, head_dim=head_dim,
                          d_model=D, tq=tq, tk=tk, out_dtype=cdt, approx_recip=approx,
                          col_blocks=(0, 1, 2))   # Q / K / V column slabs of (B, T, 3D)
    else:
        # General (cross-attention style) inputs: three separate projections, no copies.
        xk = key.astype(cdt)
        xv = value.astype(cdt)
        q = _linear(xq, prepared["wq"], prepared["bq"], out_dtype=cdt, t_blk=t_blk, n_blk=n_out)
        k = _linear(xk, prepared["wk"], prepared["bk"], out_dtype=cdt, t_blk=t_blk, n_blk=n_out)
        v = _linear(xv, prepared["wv"], prepared["bv"], out_dtype=cdt, t_blk=t_blk, n_blk=n_out)
        attn = _attention(q, k, v, num_heads=num_heads, head_dim=head_dim,
                          d_model=D, tq=tq, tk=tk, out_dtype=cdt, approx_recip=approx,
                          col_blocks=(0, 0, 0))

    # Output projection (same tiled linear kernel).
    return _linear(attn, prepared["wo"], prepared["bo"],
                   out_dtype=query.dtype, t_blk=t_blk, n_blk=n_out)


# --------------------- pure-JAX reference ----------------------------------------------

def reference(query, key, value, params, *, num_heads):
    """Reference of the PyTorch forward (mask=None, eval-mode dropout)."""
    B, T, D = query.shape
    hd = D // num_heads
    Q = query @ params["wq"] + params["bq"]
    K = key @ params["wk"] + params["bk"]
    V = value @ params["wv"] + params["bv"]
    Q = Q.reshape(B, T, num_heads, hd).transpose(0, 2, 1, 3)
    K = K.reshape(B, T, num_heads, hd).transpose(0, 2, 1, 3)
    V = V.reshape(B, T, num_heads, hd).transpose(0, 2, 1, 3)
    scores = jnp.einsum("bhqd,bhkd->bhqk", Q, K) / math.sqrt(hd)
    w = jax.nn.softmax(scores, axis=-1)
    out = jnp.einsum("bhqk,bhkd->bhqd", w, V)
    out = out.transpose(0, 2, 1, 3).reshape(B, T, D)
    return out @ params["wo"] + params["bo"]


if __name__ == "__main__":
    # Lane-aligned small config: head_dim = 128 so per-head slices are full vregs.
    B, T, D, H = 2, 128, 256, 2

    key0 = jax.random.PRNGKey(0)
    keys = jax.random.split(key0, 11)

    scale = 1.0 / math.sqrt(D)
    params = {
        "wq": jax.random.uniform(keys[0], (D, D), jnp.float32, -scale, scale),
        "bq": jax.random.uniform(keys[1], (D,), jnp.float32, -scale, scale),
        "wk": jax.random.uniform(keys[2], (D, D), jnp.float32, -scale, scale),
        "bk": jax.random.uniform(keys[3], (D,), jnp.float32, -scale, scale),
        "wv": jax.random.uniform(keys[4], (D, D), jnp.float32, -scale, scale),
        "bv": jax.random.uniform(keys[5], (D,), jnp.float32, -scale, scale),
        "wo": jax.random.uniform(keys[6], (D, D), jnp.float32, -scale, scale),
        "bo": jax.random.uniform(keys[7], (D,), jnp.float32, -scale, scale),
    }

    x = jax.random.normal(keys[8], (B, T, D), jnp.float32)          # self-attention input
    key_in = jax.random.normal(keys[9], (B, T, D), jnp.float32)     # for the general path
    value_in = jax.random.normal(keys[10], (B, T, D), jnp.float32)

    # Self-attention (query = key = value): fused concatenated-QKV path.
    ref_self = reference(x, x, x, params, num_heads=H)

    prepared_f32 = prepare_params(params, num_heads=H, compute_dtype=jnp.float32)
    out_f32 = multi_head_self_attention(x, x, x, prepared_f32)
    out_f32 = jax.block_until_ready(out_f32)
    assert out_f32.shape == (B, T, D)
    assert jnp.allclose(out_f32, ref_self, atol=5e-4, rtol=5e-4), "f32 fused path mismatch"

    prepared_bf16 = prepare_params(params, num_heads=H, compute_dtype=jnp.bfloat16)
    out_bf16 = multi_head_self_attention(x, x, x, prepared_bf16)
    out_bf16 = jax.block_until_ready(out_bf16)
    assert out_bf16.shape == (B, T, D)
    assert jnp.allclose(out_bf16, ref_self, atol=2e-2, rtol=2e-2), "bf16 fused path mismatch"

    # General path (distinct query / key / value tensors) -> separate projections.
    ref_gen = reference(x, key_in, value_in, params, num_heads=H)
    out_gen = multi_head_self_attention(x, key_in, value_in, prepared_bf16)
    out_gen = jax.block_until_ready(out_gen)
    assert out_gen.shape == (B, T, D)
    assert jnp.allclose(out_gen, ref_gen, atol=2e-2, rtol=2e-2), "bf16 general path mismatch"

    print("KERNEL_OK")
</pallas_src>

<mosaic_0001>
module attributes {stable_mosaic.version = 11 : i64} {
  func.func @_linear_kernel(%arg0: i32, %arg1: i32, %arg2: i32, %arg3: memref<1x128x256xf32, #tpu.memory_space<vmem>>, %arg4: memref<256x256xf32, #tpu.memory_space<vmem>>, %arg5: memref<1x256xf32, #tpu.memory_space<vmem>>, %arg6: memref<1x128x256xf32, #tpu.memory_space<vmem>>) attributes {dimension_semantics = [#tpu.dimension_semantics<parallel>, #tpu.dimension_semantics<parallel>, #tpu.dimension_semantics<arbitrary>], iteration_bounds = array<i64: 2, 1, 3>, scalar_prefetch = 0 : i64, scratch_operands = 0 : i64, tpu.core_type = #tpu.core_type<tc>, window_params = [{transform_indices = @transform_0, window_bounds = array<i64: 1, 128, 256>}, {transform_indices = @transform_1, window_bounds = array<i64: 256, 256>}, {transform_indices = @transform_2, window_bounds = array<i64: 1, 256>}, {transform_indices = @transform_3, window_bounds = array<i64: 1, 128, 256>}]} {
    %c0 = arith.constant 0 : index
    %c0_0 = arith.constant 0 : index
    %c0_1 = arith.constant 0 : index
    %0 = vector.load %arg3[%c0, %c0_0, %c0_1] : memref<1x128x256xf32, #tpu.memory_space<vmem>>, vector<1x128x256xf32>
    %1 = vector.shape_cast %0 : vector<1x128x256xf32> to vector<128x256xf32>
    %c0_2 = arith.constant 0 : index
    %c0_3 = arith.constant 0 : index
    %2 = vector.load %arg4[%c0_2, %c0_3] : memref<256x256xf32, #tpu.memory_space<vmem>>, vector<256x256xf32>
    %cst = arith.constant dense<0.000000e+00> : vector<128x256xf32>
    %3 = tpu.matmul %1, %2, %cst {dimension_numbers = #tpu.dot_dimension_numbers<[1], [0], [0], [1], [0, 0, 1, 1], [], []>} : vector<128x256xf32>, vector<256x256xf32>, vector<128x256xf32> -> vector<128x256xf32>
    %c0_4 = arith.constant 0 : index
    %c0_5 = arith.constant 0 : index
    %4 = vector.load %arg5[%c0_4, %c0_5] : memref<1x256xf32, #tpu.memory_space<vmem>>, vector<1x256xf32>
    %5 = vector.broadcast %4 : vector<1x256xf32> to vector<128x256xf32>
    %6 = arith.addf %3, %5 : vector<128x256xf32>
    %c0_6 = arith.constant 0 : index
    %c0_7 = arith.constant 0 : index
    %c0_8 = arith.constant 0 : index
    %7 = vector.load %arg6[%c0_6, %c0_7, %c0_8] : memref<1x128x256xf32, #tpu.memory_space<vmem>>, vector<1x128x256xf32>
    %8 = vector.shape_cast %7 : vector<1x128x256xf32> to vector<128x256xf32>
    %9 = vector.shape_cast %6 : vector<128x256xf32> to vector<1x128x256xf32>
    tpu.vector_store %arg6[%c0_6, %c0_7, %c0_8], %9 {strides = array<i32>} : memref<1x128x256xf32, #tpu.memory_space<vmem>>, vector<1x128x256xf32>,
    return
  }
  func.func @transform_0(%arg0: i32, %arg1: i32, %arg2: i32) -> (i32, i32, i32) {
    %c0_i32 = arith.constant 0 : i32
    %c0_i32_0 = arith.constant 0 : i32
    return %arg0, %arg1, %c0_i32 : i32, i32, i32
  }
  func.func @transform_1(%arg0: i32, %arg1: i32, %arg2: i32) -> (i32, i32) {
    %c0_i32 = arith.constant 0 : i32
    %c0_i32_0 = arith.constant 0 : i32
    return %c0_i32, %arg2 : i32, i32
  }
  func.func @transform_2(%arg0: i32, %arg1: i32, %arg2: i32) -> (i32, i32) {
    %c0_i32 = arith.constant 0 : i32
    %c0_i32_0 = arith.constant 0 : i32
    return %c0_i32, %arg2 : i32, i32
  }
  func.func @transform_3(%arg0: i32, %arg1: i32, %arg2: i32) -> (i32, i32, i32) {
    %c0_i32 = arith.constant 0 : i32
    return %arg0, %arg1, %arg2 : i32, i32, i32
  }
}

</mosaic_0001>

<bundles_post_ra>
// kernel: tpu_custom_call.1
= control target key start
LH: loop header
LB: loop body
LE: loop exit
PB: predicated region body
PF: predicated region fallthrough
CT: control target
= control target key end

     0   :  { %s1752_s0 = inlined_call_operand.hbm [shape: f32[2,128,256], index: 0, kind: input, shape index: {}]   ;;  %s1753_s1 = inlined_call_operand.hbm [shape: f32[256,768], index: 1, kind: input, shape index: {}]   ;;  %s1754_s2 = inlined_call_operand.hbm [shape: f32[1,768], index: 2, kind: input, shape index: {}]   ;;  %s1755_s3 = inlined_call_operand.hbm [shape: f32[2,128,768], index: 3, kind: output, shape index: {}]  }
   0x1   :  { %1768 = sst [smem:[#allocation23_spill]] %s1753_s1 }
   0x2   :  { %1769 = sst [smem:[#allocation24_spill]] %s1755_s3 }
   0x3   :  { %8 = vsyncpa [#allocation3], 0 }
   0x4   :  { %10 = vsyncpa [#allocation3 + $0x1], 0 }
   0x5   :  { %11 = vsyncpa [#allocation6], 0 }
   0x6   :  { %13 = vsyncpa [#allocation6 + $0x1], 0 }
   0x7   :  { %14 = vsyncpa [#allocation4], 0 }
   0x8   :  { %16 = vsyncpa [#allocation4 + $0x1], 0  ;;  %s1252_s12 = smov 0   ;;  %s1254_s13 = smov 0  }
   0x9   :  { %s1256_s14 = smov 0   ;;  %s1258_s15 = smov 0  }
   0xa   :  { %s1260_s16 = smov 0   ;;  %s1262_s17 = smov 0  }
   0xb   :  { %s1264_s18 = smov 0   ;;  %s1266_s19 = smov 0  }
   0xc   :  { %s1268_s20 = smov 0   ;;  %s1270_s21 = smov 0  }
   0xd   :  { %s1272_s22 = smov 0   ;;  %s1274_s23 = smov 0  }
   0xe   :  { %s1276_s24 = smov 0   ;;  %s1278_s25 = smov 0  }
   0xf LB: > { %1770 = sst [smem:[#allocation12_spill]] %s1168_s12  ;;  %s34_s26 = sadd.s32 1, %s1212_s23  ;;  %s1220_s25 = sphi %s1278_s25, %s22_s25   ;;  %s1216_s24 = sphi %s1276_s24, %s1822_s24   ;;  %s1212_s23 = sphi %s1274_s23, %s1821_s23   ;;  %s1208_s22 = sphi %s1272_s22, %s1820_s22   ;;  %s1204_s21 = sphi %s1270_s21, %s1819_s21   ;;  %s1200_s20 = sphi %s1268_s20, %s1809_s20   ;;  %s1196_s19 = sphi %s1266_s19, %s1818_s19   ;;  %s1192_s18 = sphi %s1264_s18, %s1817_s18   ;;  %s1188_s17 = sphi %s1262_s17, %s1816_s17   ;;  %s1184_s16 = sphi %s1260_s16, %s1815_s16   ;;  %s1180_s15 = sphi %s1258_s15, %s1814_s15   ;;  %s1176_s14 = sphi %s1256_s14, %s1806_s14   ;;  %s1172_s13 = sphi %s1254_s13, %s1813_s13   ;;  %s1168_s12 = sphi %s1252_s12, %s1812_s12  }
  0x10   : > { %1771 = sst [smem:[#allocation13_spill]] %s1176_s14  ;;  %p58_p0 = scmp.eq.s32.totalorder %s1220_s25, 0 }
  0x11   : > { %1772 = sst [smem:[#allocation14_spill]] %s1200_s20  ;;  %p1326_p1 = scmp.ge.s32.totalorder %s34_s26, 3 }
  0x12   : > { %1773 = sst [smem:[#allocation15_spill]] %s1204_s21  ;;  %p83_p2 = scmp.ne.s32.totalorder %s1188_s17, %s1184_s16 }
  0x13   : > { %1774 = sst [smem:[#allocation16_spill]] %s1208_s22  ;;  %p89_p3 = scmp.ne.s32.totalorder %s1184_s16, %s1180_s15 }
  0x14   : > { %p868_p4 = scmp.lt.s32.totalorder %s1220_s25, 6  ;;  %p85_p5 = por %p83_p2, %p58_p0 }
  0x15   : > { %s193_s29 = sand.u32 1, %s1220_s25   ;;  %s1756_s30 = sand.u32 1, %s1188_s17  }
  0x16   : > { %s762_s4 = sshll.u32 %s1756_s30, 9  ;;  %s779_s5 = sshll.u32 %s1212_s23, 8 }
  0x17   : > { %s1776_s1 = sld [smem:[#allocation23_spill]]  ;;  %s197_s9 = scalar_lea.vmem [#allocation5], %s762_s4 }
  0x18   : > { %s204_s10 = sshll.u32 %s197_s9, 4  ;;  %p1348_p6 = pnand %p868_p4, %p85_p5  ;;  %s205_s10 = int_to_ptr.vmem [resolvable:$true] %s204_s10 }
  0x19   : > { %p768_p7 = scmp.ge.s32.totalorder %s1220_s25, 1  ;;  %s1353_s28 = scalar_lea.sflag [#allocation6], %s193_s29 }
  0x1a   : > { %p1762_p8 = pneg %p1348_p6  ;;  %s1001_s30 = scalar_lea.vmem %s205_s10, 8192 }
  0x1b   : > { %p1002_p9 = scmp.ne.s32.totalorder %s205_s10, %s1001_s30  ;;  %s1222_s4 = smov [#allocation5]  }
  0x1d   : > { %s203_s8 = scalar_lea.hbm %s1776_s1, %s779_s5  ;;  %p1004_p10 = pnand %p1002_p9, %p1762_p8 }
  0x1e   : > { %s1006_s5 = sshll.u32 %s1222_s4, 4  ;;  %s1007_s5 = int_to_ptr.vmem [resolvable:$false] %s1006_s5 }
  0x1f   : > { %p1005_p11 = pneg %p1004_p10  ;;  %s1008_s6 = scalar_lea.vmem %s1007_s5, 16384 }
  0x20   : > { %p1009_p12 = scmp.lt.s32.totalorder %s205_s10, %s1007_s5  ;;  %p1010_p13 = scmp.lt.s32.totalorder %s1008_s6, %s1001_s30 }
  0x22   : > { %p1011_p2 = por %p1010_p13, %p1009_p12 }
  0x24   : > { %p1012_p5 = pnand %p1011_p2, %p1005_p11 }
  0x26   : > { %1015 = shalt.err (!%p1012_p5)
}
  0x27   : > { %s1223_s7 = smov 768   ;;  %s1757_s29 = smov 256  }
  0x28   : > { %s1758_s30 = smov 16   ;;  %p231_p9 = scmp.lt.s32.totalorder %s1220_s25, 7 }
  0x29   : > { %860 = dma.hbm_to_vmem [thread:$0]  (!%p1348_p6), %s203_s8, 8192, %s205_s10, %s1353_s28, %s1223_s7, %s1757_s29, %s1758_s30  }
  0x2a   : > { %p1368_p10 = pnand %p768_p7, %p231_p9  ;;  %s1373_s4 = sadd.s32 4294967295, %s1220_s25  }
  0x2b   : > { %s756_s5 = sadd.s32 4294967294, %s1220_s25   ;;  %s1824_s26 = smov (%p1326_p1, %s34_s26), 0 }
  0x2c   : > { %1779 = sst [smem:[#allocation17_spill]] %s1824_s26  ;;  %s41_s6 = sadd.s32 1, %s1216_s24 }
  0x2d   : > { %s50_s8 = sadd.s32 1, %s1200_s20  ;;  %s1826_s6 = smov (!%p1326_p1, %s41_s6), %s1216_s24 }
  0x2e   : > { %p57_p7 = scmp.ne.s32.totalorder %s1200_s20, %s1196_s19  ;;  %p63_p11 = scmp.ne.s32.totalorder %s1196_s19, %s1192_s18 }
  0x2f   : > { %p43_p12 = scmp.ge.s32.totalorder %s1826_s6, 2  ;;  %p64_p13 = scmp.eq.s32.totalorder %s1373_s4, 0 }
  0x30   : > { %p1394_p2 = por %p58_p0, %p57_p7  ;;  %s73_s7 = ssub.s32 %s1212_s23, %s1824_s26 }
  0x31   : > { %s1828_s6 = smov (%p43_p12, %s1826_s6), 0  ;;  %p1402_p1 = por %p64_p13, %p63_p11 }
  0x32   : > { %1781 = sst [smem:[#allocation18_spill]] %s1828_s6  ;;  %p74_p5 = scmp.eq.s32.totalorder %s73_s7, 0 }
  0x33   : > { %s45_s18 = ssub.s32 %s1216_s24, %s1828_s6  ;;  %p1411_p9 = por %p89_p3, %p64_p13 }
  0x34   : > { %p48_p0 = scmp.eq.s32.totalorder %s45_s18, 0  ;;  %s129_s30 = sor.u32 %s73_s7, %s45_s18 }
  0x35   : > { %s1784_s1 = sadd.s32 1, %s1188_s17  ;;  %p130_p7 = scmp.eq.s32.totalorder %s129_s30, 0 }
  0x36   : > { %s1418_s26 = scalar_select %p74_p5, %s1188_s17, %s1784_s1  }
  0x37   : > { %s1421_s3 = scalar_select %p48_p0, %s1200_s20, %s50_s8  }
  0x38   : > { %1785 = sst [smem:[#allocation19_spill]] %s1418_s26  ;;  %s132_s21 = sadd.s32 1, %s1176_s14 }
  0x39   : > { %1786 = sst [smem:[#allocation20_spill]] %s1421_s3  ;;  %p142_p11 = scmp.ne.s32.totalorder %s1176_s14, %s1172_s13 }
  0x3a   : > { %p143_p12 = scmp.eq.s32.totalorder %s1373_s4, 5  ;;  %p148_p13 = scmp.ne.s32.totalorder %s1172_s13, %s1168_s12 }
  0x3b   : > { %s1428_s15 = scalar_select %p130_p7, %s1176_s14, %s132_s21  }
  0x3c   : > { %p1430_p3 = por %p143_p12, %p142_p11  ;;  %p149_p8 = scmp.eq.s32.totalorder %s756_s5, 5 }
  0x3d   : > { %1787 = sst [smem:[#allocation21_spill]] %s1428_s15  ;;  %s169_s1 = sand.u32 1, %s1200_s20  }
  0x3e   : > { %s1788_s6 = scalar_select %p1430_p3, 1, 0 }
  0x3f   : > { %s759_s7 = sshll.u32 %s169_s1, 8  ;;  %p1437_p5 = por %p149_p8, %p148_p13 }
  0x40   : > { %s778_s30 = sshll.u32 %s1216_s24, 12  ;;  %s173_s18 = scalar_lea.vmem [#allocation2], %s759_s7 }
  0x41   : > { %s1789_s8 = scalar_select %p1437_p5, 1, 0 }
  0x42   : > { %s183_s3 = sshll.u32 %s173_s18, 4  ;;  %s182_s21 = scalar_lea.hbm %s1752_s0, %s778_s30  ;;  %s184_s3 = int_to_ptr.vmem [resolvable:$true] %s183_s3 }
  0x43   : > { %1790 = sst [smem:[#allocation22_spill]] %s1789_s8  ;;  %p1449_p0 = pnand %p868_p4, %p1394_p2 }
  0x44   : > { %s1792_s5 = sand.u32 1, %s1188_s17   ;;  %s780_s14 = sshll.u32 %s1212_s23, 5 }
  0x45   : > { %s765_s20 = sshll.u32 %s1792_s5, 1  ;;  %s1459_s7 = scalar_lea.hbm %s1754_s2, %s780_s14 }
  0x46   : > { %s170_s18 = scalar_lea.sflag [#allocation3], %s169_s1  ;;  %p1018_p8 = pneg %p1449_p0 }
  0x47   : > { %s1029_s22 = scalar_lea.vmem %s184_s3, 4096  ;;  %s1226_s26 = smov [#allocation2]  }
  0x48   : > { %p1030_p7 = scmp.ne.s32.totalorder %s184_s3, %s1029_s22  ;;  %s1034_s10 = sshll.u32 %s1226_s26, 4  ;;  %s1035_s10 = int_to_ptr.vmem [resolvable:$false] %s1034_s10 }
  0x49   : > { %s1036_s30 = scalar_lea.vmem %s1035_s10, 8192  ;;  %p1037_p4 = scmp.lt.s32.totalorder %s184_s3, %s1035_s10 }
  0x4a   : > { %p1032_p11 = pnand %p1030_p7, %p1018_p8  ;;  %p1038_p2 = scmp.lt.s32.totalorder %s1036_s30, %s1029_s22 }
  0x4c   : > { %p1033_p12 = pneg %p1032_p11  ;;  %p1039_p13 = por %p1038_p2, %p1037_p4 }
  0x4e   : > { %p1040_p5 = pnand %p1039_p13, %p1033_p12 }
  0x50   : > { %1043 = shalt.err (!%p1040_p5)
}
  0x51   : > { %s1793_s12 = smov 16   ;;  %s1794_s14 = smov 256  }
  0x52   : > { %857 = dma.hbm_to_vmem [thread:$0]  (!%p1449_p0), %s182_s21, 4096, %s184_s3, %s170_s18, %s1794_s14, %s1794_s14, %s1793_s12  }
  0x53   : > { %s218_s1 = scalar_lea.vmem [#allocation7], %s765_s20  ;;  %p1795_p7 = pneg %p1348_p6 }
  0x54   : > { %s226_s8 = sshll.u32 %s218_s1, 4  ;;  %s1227_s22 = smov [#allocation7]   ;;  %s227_s8 = int_to_ptr.vmem [resolvable:$true] %s226_s8 }
  0x55   : > { %s1057_s5 = scalar_lea.vmem %s227_s8, 32  ;;  %s1062_s26 = sshll.u32 %s1227_s22, 4  ;;  %s1063_s26 = int_to_ptr.vmem [resolvable:$false] %s1062_s26 }
  0x56   : > { %p1058_p8 = scmp.ne.s32.totalorder %s227_s8, %s1057_s5  ;;  %s1064_s10 = scalar_lea.vmem %s1063_s26, 64 }
  0x57   : > { %p1065_p5 = scmp.lt.s32.totalorder %s227_s8, %s1063_s26  ;;  %p1066_p12 = scmp.lt.s32.totalorder %s1064_s10, %s1057_s5 }
  0x58   : > { %p1060_p11 = pnand %p1058_p8, %p1795_p7 }
  0x59   : > { %p1067_p4 = por %p1066_p12, %p1065_p5 }
  0x5a   : > { %p1061_p3 = pneg %p1060_p11 }
  0x5c   : > { %p1068_p2 = pnand %p1067_p4, %p1061_p3 }
  0x5e   : > { %1071 = shalt.err (!%p1068_p2)
}
  0x5f   : > { %863 = dma.hbm_to_vmem [thread:$0]  (!%p1348_p6), %s1459_s7, 32, %s227_s8, %s1353_s28  }
  0x60   : > { %235 = sbr.rel (%p1368_p10) target bundleno = 412 (0x19c), region = 32  ;;  %s237_s3 = sand.u32 (!%p1368_p10), 1, %s1196_s19  }
  0x61   : > { %s769_s20 = sshll.u32 (!%p1368_p10), %s237_s3, 8  ;;  %s238_s15 = scalar_lea.sflag (!%p1368_p10), [#allocation3], %s237_s3 }
  0x62   : > { %s1478_s21 = scalar_lea.vmem (!%p1368_p10), [#allocation2], %s769_s20 }
  0x65   : > { %1155 = dma.done.wait (%p1402_p1), %s238_s15, 4096  }
  0x66   : > { %1157 = vsyncadd (%p1402_p1), %s238_s15, 4294963200  ;;  %s246_s28 = sand.u32 1, %s1373_s4   ;;  %s248_s11 = sand.u32 1, %s1184_s16  }
  0x67   : > { %s770_s9 = sshll.u32 %s248_s11, 9  ;;  %s247_s7 = scalar_lea.sflag [#allocation6], %s246_s28 }
  0x68   : > { %s1488_s18 = scalar_lea.vmem [#allocation5], %s770_s9 }
  0x69   : > { %1159 = dma.done.wait (%p1411_p9), %s247_s7, 8224  }
  0x6a   : > { %1161 = vsyncadd (%p1411_p9), %s247_s7, 4294959072  ;;  %v360_v0 = vld [vmem:[%s1488_s18 + $0xf8] sm:$0xff]  ;;  %v359_v1 = vld [vmem:[%s1488_s18 + $0xf0] sm:$0xff]  ;;  %s771_s29 = sshll.u32 %s248_s11, 1  ;;  %s289_s4 = sand.u32 1, %s1172_s13  }
  0x6b   : > { %v358_v2 = vld [vmem:[%s1488_s18 + $0xe8] sm:$0xff]  ;;  %405 = vmatprep.subr.mxu0 %v360_v0  ;;  %781 = vmatprep.subr.mxu1 %v360_v0  ;;  %v357_v3 = vld [vmem:[%s1488_s18 + $0xe0] sm:$0xff]  ;;  %v356_v4 = vld [vmem:[%s1488_s18 + $0xd8] sm:$0xff]  ;;  %s259_s27 = scalar_lea.vmem [#allocation7], %s771_s29  ;;  %s772_s30 = sshll.u32 %s289_s4, 8 }
  0x6c   : > { %406 = vmatpush1.msra.mxu0 %v359_v1  ;;  %813 = vmatpush1.msra.mxu1 %v359_v1  ;;  %v355_v5 = vld [vmem:[%s1488_s18 + $0xd0] sm:$0xff]  ;;  %v354_v6 = vld [vmem:[%s1488_s18 + $0xc8] sm:$0xff]  ;;  %v353_v7 = vld [vmem:[%s1488_s18 + $0xc0] sm:$0xff]  ;;  %s1601_s12 = scalar_lea.vmem [#allocation8], %s772_s30  ;;  %s1796_s14 = sld [smem:[#allocation16_spill]] }
  0x6d   : > { %407 = vmatprep.subr.mxu0 %v358_v2  ;;  %782 = vmatprep.subr.mxu1 %v358_v2  ;;  %v352_v8 = vld [vmem:[%s1488_s18 + $0xb8] sm:$0xff]  ;;  %v351_v9 = vld [vmem:[%s1488_s18 + $0xb0] sm:$0xff]  ;;  %v350_v10 = vld [vmem:[%s1488_s18 + $0xa8] sm:$0xff]  ;;  %s1797_s1 = sld [smem:[#allocation15_spill]]  ;;  %s617_s10 = sshll.u32 %s1601_s12, 4  ;;  %s1667_s10 = int_to_ptr.vmem [resolvable:$true] %s617_s10 }
  0x6e   : > { %408 = vmatpush1.msra.mxu0 %v357_v3  ;;  %814 = vmatpush1.msra.mxu1 %v357_v3  ;;  %v349_v11 = vld [vmem:[%s1488_s18 + $0xa0] sm:$0xff]  ;;  %v348_v12 = vld [vmem:[%s1488_s18 + $0x98] sm:$0xff]  ;;  %v347_v13 = vld [vmem:[%s1488_s18 + $0x90] sm:$0xff]  ;;  %s1798_s15 = sld [smem:[#allocation24_spill]]  ;;  %s1677_s11 = scalar_lea.sflag [#allocation4], %s289_s4 }
  0x6f   : > { %409 = vmatprep.subr.mxu0 %v356_v4  ;;  %783 = vmatprep.subr.mxu1 %v356_v4  ;;  %v346_v14 = vld [vmem:[%s1488_s18 + $0x88] sm:$0xff]  ;;  %v345_v15 = vld [vmem:[%s1488_s18 + $0x80] sm:$0xff]  ;;  %v344_v16 = vld [vmem:[%s1488_s18 + $0x78] sm:$0xff]  ;;  %s1072_s9 = scalar_lea.vmem %s1667_s10, 4096  ;;  %p1800_p10 = scmp.ne.s32.totalorder %s1788_s6, 0 }
  0x70   : > { %410 = vmatpush1.msra.mxu0 %v355_v5  ;;  %815 = vmatpush1.msra.mxu1 %v355_v5  ;;  %v343_v17 = vld [vmem:[%s1488_s18 + $0x70] sm:$0xff]  ;;  %v342_v18 = vld [vmem:[%s1488_s18 + $0x68] sm:$0xff]  ;;  %v341_v19 = vld [vmem:[%s1488_s18 + $0x60] sm:$0xff]  ;;  %p1073_p6 = scmp.ne.s32.totalorder %s1667_s10, %s1072_s9  ;;  %s1228_s7 = smov [#allocation8]  }
  0x71   : > { %411 = vmatprep.subr.mxu0 %v354_v6  ;;  %784 = vmatprep.subr.mxu1 %v354_v6  ;;  %v340_v20 = vld [vmem:[%s1488_s18 + $0x58] sm:$0xff]  ;;  %v339_v21 = vld [vmem:[%s1488_s18 + $0x50] sm:$0xff]  ;;  %v338_v22 = vld [vmem:[%s1488_s18 + $0x48] sm:$0xff] }
  0x72   : > { %412 = vmatpush1.msra.mxu0 %v353_v7  ;;  %816 = vmatpush1.msra.mxu1 %v353_v7  ;;  %v337_v23 = vld [vmem:[%s1488_s18 + $0x40] sm:$0xff]  ;;  %v336_v24 = vld [vmem:[%s1488_s18 + $0x38] sm:$0xff]  ;;  %v335_v25 = vld [vmem:[%s1488_s18 + $0x30] sm:$0xff]  ;;  %s845_s8 = smul.u32 96, %s1796_s14  ;;  %p1074_p1 = pnand %p1073_p6, %p1800_p10 }
  0x73   : > { %413 = vmatprep.subr.mxu0 %v352_v8  ;;  %785 = vmatprep.subr.mxu1 %v352_v8  ;;  %v334_v26 = vld [vmem:[%s1488_s18 + $0x28] sm:$0xff]  ;;  %v333_v27 = vld [vmem:[%s1488_s18 + $0x20] sm:$0xff]  ;;  %v332_v28 = vld [vmem:[%s1488_s18 + $0x18] sm:$0xff]  ;;  %s774_s5 = sshll.u32 %s1797_s1, 1 }
  0x74   : > { %414 = vmatpush1.msra.mxu0 %v351_v9  ;;  %817 = vmatpush1.msra.mxu1 %v351_v9  ;;  %v331_v29 = vld [vmem:[%s1488_s18 + $0x10] sm:$0xff]  ;;  %v330_v30 = vld [vmem:[%s1488_s18 + $0x8] sm:$0xff]  ;;  %v329_v31 = vld [vmem:[%s1488_s18] sm:$0xff]  ;;  %s614_s22 = sadd.s32 %s845_s8, %s774_s5  ;;  %s1799_s28 = smov %s1798_s15 }
  0x75   : > { %415 = vmatprep.subr.mxu0 %v350_v10  ;;  %786 = vmatprep.subr.mxu1 %v350_v10  ;;  %v392_v32 = vld [vmem:[%s1488_s18 + $0x1f8] sm:$0xff]  ;;  %v391_v33 = vld [vmem:[%s1488_s18 + $0x1f0] sm:$0xff]  ;;  %v390_v34 = vld [vmem:[%s1488_s18 + $0x1e8] sm:$0xff]  ;;  %s775_s26 = sshll.u32 %s614_s22, 7  ;;  %p1075_p9 = pneg %p1074_p1 }
  0x76   : > { %416 = vmatpush1.msra.mxu0 %v349_v11  ;;  %818 = vmatpush1.msra.mxu1 %v349_v11  ;;  %v389_v35 = vld [vmem:[%s1488_s18 + $0x1e0] sm:$0xff]  ;;  %v388_v36 = vld [vmem:[%s1488_s18 + $0x1d8] sm:$0xff]  ;;  %v387_v37 = vld [vmem:[%s1488_s18 + $0x1d0] sm:$0xff] }
  0x77   : > { %417 = vmatprep.subr.mxu0 %v348_v12  ;;  %787 = vmatprep.subr.mxu1 %v348_v12  ;;  %v386_v38 = vld [vmem:[%s1488_s18 + $0x1c8] sm:$0xff]  ;;  %v385_v39 = vld [vmem:[%s1488_s18 + $0x1c0] sm:$0xff]  ;;  %v384_v40 = vld [vmem:[%s1488_s18 + $0x1b8] sm:$0xff] }
  0x78   : > { %418 = vmatpush1.msra.mxu0 %v347_v13  ;;  %819 = vmatpush1.msra.mxu1 %v347_v13  ;;  %v383_v41 = vld [vmem:[%s1488_s18 + $0x1b0] sm:$0xff]  ;;  %v382_v42 = vld [vmem:[%s1488_s18 + $0x1a8] sm:$0xff]  ;;  %v381_v43 = vld [vmem:[%s1488_s18 + $0x1a0] sm:$0xff] }
  0x79   : > { %419 = vmatprep.subr.mxu0 %v346_v14  ;;  %788 = vmatprep.subr.mxu1 %v346_v14  ;;  %v380_v44 = vld [vmem:[%s1488_s18 + $0x198] sm:$0xff]  ;;  %v379_v45 = vld [vmem:[%s1488_s18 + $0x190] sm:$0xff]  ;;  %v378_v46 = vld [vmem:[%s1488_s18 + $0x188] sm:$0xff] }
  0x7a   : > { %420 = vmatpush1.msra.mxu0 %v345_v15  ;;  %820 = vmatpush1.msra.mxu1 %v345_v15  ;;  %v377_v47 = vld [vmem:[%s1488_s18 + $0x180] sm:$0xff]  ;;  %v376_v48 = vld [vmem:[%s1488_s18 + $0x178] sm:$0xff]  ;;  %v375_v49 = vld [vmem:[%s1488_s18 + $0x170] sm:$0xff] }
  0x7b   : > { %421 = vmatprep.subr.mxu0 %v344_v16  ;;  %789 = vmatprep.subr.mxu1 %v344_v16  ;;  %v374_v50 = vld [vmem:[%s1488_s18 + $0x168] sm:$0xff]  ;;  %v373_v51 = vld [vmem:[%s1488_s18 + $0x160] sm:$0xff]  ;;  %v372_v52 = vld [vmem:[%s1488_s18 + $0x158] sm:$0xff] }
  0x7c   : > { %422 = vmatpush1.msra.mxu0 %v343_v17  ;;  %821 = vmatpush1.msra.mxu1 %v343_v17  ;;  %v371_v53 = vld [vmem:[%s1488_s18 + $0x150] sm:$0xff]  ;;  %v370_v54 = vld [vmem:[%s1488_s18 + $0x148] sm:$0xff]  ;;  %v369_v55 = vld [vmem:[%s1488_s18 + $0x140] sm:$0xff] }
  0x7d   : > { %423 = vmatprep.subr.mxu0 %v342_v18  ;;  %790 = vmatprep.subr.mxu1 %v342_v18  ;;  %v368_v56 = vld [vmem:[%s1488_s18 + $0x138] sm:$0xff]  ;;  %v367_v57 = vld [vmem:[%s1488_s18 + $0x130] sm:$0xff]  ;;  %v366_v58 = vld [vmem:[%s1488_s18 + $0x128] sm:$0xff] }
  0x7e   : > { %424 = vmatpush1.msra.mxu0 %v341_v19  ;;  %822 = vmatpush1.msra.mxu1 %v341_v19  ;;  %v365_v59 = vld [vmem:[%s1488_s18 + $0x120] sm:$0xff]  ;;  %v364_v60 = vld [vmem:[%s1488_s18 + $0x118] sm:$0xff]  ;;  %v363_v61 = vld [vmem:[%s1488_s18 + $0x110] sm:$0xff] }
  0x7f   : > { %425 = vmatprep.subr.mxu0 %v340_v20  ;;  %791 = vmatprep.subr.mxu1 %v340_v20  ;;  %v362_v62 = vld [vmem:[%s1488_s18 + $0x108] sm:$0xff]  ;;  %v361_v63 = vld [vmem:[%s1488_s18 + $0x100] sm:$0xff]  ;;  %v300_v4 = vld [vmem:[%s1478_s21 + $0x18] sm:$0xff]  ;;  %s1076_s18 = sshll.u32 %s1228_s7, 4  ;;  %s1077_s18 = int_to_ptr.vmem [resolvable:$false] %s1076_s18 }
  0x80   : > { %426 = vmatpush1.msra.mxu0 %v339_v21  ;;  %823 = vmatpush1.msra.mxu1 %v339_v21  ;;  %v298_v0 = vld [vmem:[%s1478_s21 + $0x8] sm:$0xff]  ;;  %v297_v2 = vld [vmem:[%s1478_s21] sm:$0xff]  ;;  %v316_v5 = vld [vmem:[%s1478_s21 + $0x98] sm:$0xff]  ;;  %s1078_s29 = scalar_lea.vmem %s1077_s18, 8192  ;;  %p1079_p3 = scmp.lt.s32.totalorder %s1667_s10, %s1077_s18 }
  0x81   : > { %427 = vmatprep.subr.mxu0 %v338_v22  ;;  %792 = vmatprep.subr.mxu1 %v338_v22  ;;  %v314_v1 = vld [vmem:[%s1478_s21 + $0x88] sm:$0xff]  ;;  %v313_v3 = vld [vmem:[%s1478_s21 + $0x80] sm:$0xff]  ;;  %v299_v6 = vld [vmem:[%s1478_s21 + $0x10] sm:$0xff]  ;;  %p1080_p0 = scmp.lt.s32.totalorder %s1078_s29, %s1072_s9 }
  0x82   : > { %428 = vmatpush1.msra.mxu0 %v337_v23  ;;  %824 = vmatpush1.msra.mxu1 %v337_v23  ;;  %v315_v7 = vld [vmem:[%s1478_s21 + $0x90] sm:$0xff]  ;;  %v302_v8 = vld [vmem:[%s1478_s21 + $0x28] sm:$0xff]  ;;  %v301_v10 = vld [vmem:[%s1478_s21 + $0x20] sm:$0xff] }
  0x83   : > { %429 = vmatprep.subr.mxu0 %v336_v24  ;;  %793 = vmatprep.subr.mxu1 %v336_v24  ;;  %v318_v9 = vld [vmem:[%s1478_s21 + $0xa8] sm:$0xff]  ;;  %v317_v11 = vld [vmem:[%s1478_s21 + $0xa0] sm:$0xff]  ;;  %v304_v12 = vld [vmem:[%s1478_s21 + $0x38] sm:$0xff]  ;;  %p1081_p13 = por %p1080_p0, %p1079_p3 }
  0x84   : > { %430 = vmatpush1.msra.mxu0 %v335_v25  ;;  %825 = vmatpush1.msra.mxu1 %v335_v25  ;;  %v320_v13 = vld [vmem:[%s1478_s21 + $0xb8] sm:$0xff]  ;;  %v303_v14 = vld [vmem:[%s1478_s21 + $0x30] sm:$0xff]  ;;  %v306_v16 = vld [vmem:[%s1478_s21 + $0x48] sm:$0xff] }
  0x85   : > { %431 = vmatprep.subr.mxu0 %v334_v26  ;;  %794 = vmatprep.subr.mxu1 %v334_v26  ;;  %v319_v15 = vld [vmem:[%s1478_s21 + $0xb0] sm:$0xff]  ;;  %v322_v17 = vld [vmem:[%s1478_s21 + $0xc8] sm:$0xff]  ;;  %v305_v18 = vld [vmem:[%s1478_s21 + $0x40] sm:$0xff]  ;;  %p1082_p8 = pnand %p1081_p13, %p1075_p9 }
  0x86   : > { %432 = vmatpush1.msra.mxu0 %v333_v27  ;;  %826 = vmatpush1.msra.mxu1 %v333_v27  ;;  %v321_v19 = vld [vmem:[%s1478_s21 + $0xc0] sm:$0xff]  ;;  %v308_v20 = vld [vmem:[%s1478_s21 + $0x58] sm:$0xff]  ;;  %v307_v22 = vld [vmem:[%s1478_s21 + $0x50] sm:$0xff] }
  0x87   : > { %433 = vmatprep.subr.mxu0 %v332_v28  ;;  %795 = vmatprep.subr.mxu1 %v332_v28  ;;  %v324_v21 = vld [vmem:[%s1478_s21 + $0xd8] sm:$0xff]  ;;  %v323_v23 = vld [vmem:[%s1478_s21 + $0xd0] sm:$0xff]  ;;  %v310_v24 = vld [vmem:[%s1478_s21 + $0x68] sm:$0xff] }
  0x88   : > { %434 = vmatpush1.msra.mxu0 %v331_v29  ;;  %827 = vmatpush1.msra.mxu1 %v331_v29  ;;  %v326_v25 = vld [vmem:[%s1478_s21 + $0xe8] sm:$0xff]  ;;  %v309_v26 = vld [vmem:[%s1478_s21 + $0x60] sm:$0xff]  ;;  %v312_v28 = vld [vmem:[%s1478_s21 + $0x78] sm:$0xff] }
  0x89   : > { %435 = vmatprep.subr.mxu0 %v330_v30  ;;  %796 = vmatprep.subr.mxu1 %v330_v30  ;;  %v325_v27 = vld [vmem:[%s1478_s21 + $0xe0] sm:$0xff]  ;;  %v328_v29 = vld [vmem:[%s1478_s21 + $0xf8] sm:$0xff]  ;;  %v311_v30 = vld [vmem:[%s1478_s21 + $0x70] sm:$0xff] }
  0x8a   : > { %436 = vmatpush1.msra.mxu0 %v329_v31  ;;  %828 = vmatpush1.msra.mxu1 %v329_v31  ;;  %v327_v31 = vld [vmem:[%s1478_s21 + $0xf0] sm:$0xff]  ;;  %s1665_s21 = scalar_lea.hbm %s1798_s15, %s775_s26 }
  0x8b   : > { %437 = vmatprep.subr.mxu0 %v392_v32  ;;  %797 = vmatprep.subr.mxu1 %v392_v32  ;;  %v395_v32 = vlaneseq }
  0x8c   : > { %438 = vmatpush2.msra.mxu0 %v391_v33  ;;  %829 = vmatpush2.msra.mxu1 %v391_v33 }
  0x8d   : > { %439 = vmatprep.subr.mxu0 %v390_v34  ;;  %798 = vmatprep.subr.mxu1 %v390_v34  ;;  %v396_v33 = vshrl.u32 %v395_v32, 7 }
  0x8e   : > { %440 = vmatpush2.msra.mxu0 %v389_v35  ;;  %830 = vmatpush2.msra.mxu1 %v389_v35  ;;  %v393_v35 = vld [vmem:[%s259_s27] sm:$0x3] }
  0x8f   : > { %441 = vmatprep.subr.mxu0 %v388_v36  ;;  %799 = vmatprep.subr.mxu1 %v388_v36  ;;  %v397_v34 = vsub.s32 0, %v396_v33  ;;  %v401_v36 = vsub.s32 1, %v396_v33 }
  0x90   : > { %442 = vmatpush2.msra.mxu0 %v387_v37  ;;  %831 = vmatpush2.msra.mxu1 %v387_v37 }
  0x91   : > { %443 = vmatprep.subr.mxu0 %v386_v38  ;;  %800 = vmatprep.subr.mxu1 %v386_v38  ;;  %v1595_v37 = vrot.slane %v393_v35, %v397_v34  ;;  %v1597_v38 = vrot.slane %v393_v35, %v401_v36 }
  0x92   : > { %444 = vmatpush2.msra.mxu0 %v385_v39  ;;  %832 = vmatpush2.msra.mxu1 %v385_v39 }
  0x93   : > { %445 = vmatprep.subr.mxu0 %v384_v40  ;;  %801 = vmatprep.subr.mxu1 %v384_v40 }
  0x94   : > { %446 = vmatpush2.msra.mxu0 %v383_v41  ;;  %833 = vmatpush2.msra.mxu1 %v383_v41 }
  0x95   : > { %447 = vmatprep.subr.mxu0 %v382_v42  ;;  %802 = vmatprep.subr.mxu1 %v382_v42 }
  0x96   : > { %448 = vmatpush2.msra.mxu0 %v381_v43  ;;  %834 = vmatpush2.msra.mxu1 %v381_v43 }
  0x97   : > { %449 = vmatprep.subr.mxu0 %v380_v44  ;;  %803 = vmatprep.subr.mxu1 %v380_v44 }
  0x98   : > { %450 = vmatpush2.msra.mxu0 %v379_v45  ;;  %835 = vmatpush2.msra.mxu1 %v379_v45 }
  0x99   : > { %451 = vmatprep.subr.mxu0 %v378_v46  ;;  %804 = vmatprep.subr.mxu1 %v378_v46 }
  0x9a   : > { %452 = vmatpush2.msra.mxu0 %v377_v47  ;;  %836 = vmatpush2.msra.mxu1 %v377_v47 }
  0x9b   : > { %453 = vmatprep.subr.mxu0 %v376_v48  ;;  %805 = vmatprep.subr.mxu1 %v376_v48 }
  0x9c   : > { %454 = vmatpush2.msra.mxu0 %v375_v49  ;;  %837 = vmatpush2.msra.mxu1 %v375_v49 }
  0x9d   : > { %455 = vmatprep.subr.mxu0 %v374_v50  ;;  %806 = vmatprep.subr.mxu1 %v374_v50 }
  0x9e   : > { %456 = vmatpush2.msra.mxu0 %v373_v51  ;;  %838 = vmatpush2.msra.mxu1 %v373_v51 }
  0x9f   : > { %457 = vmatprep.subr.mxu0 %v372_v52  ;;  %807 = vmatprep.subr.mxu1 %v372_v52 }
  0xa0   : > { %458 = vmatpush2.msra.mxu0 %v371_v53  ;;  %839 = vmatpush2.msra.mxu1 %v371_v53 }
  0xa1   : > { %459 = vmatprep.subr.mxu0 %v370_v54  ;;  %808 = vmatprep.subr.mxu1 %v370_v54 }
  0xa2   : > { %460 = vmatpush2.msra.mxu0 %v369_v55  ;;  %840 = vmatpush2.msra.mxu1 %v369_v55 }
  0xa3   : > { %461 = vmatprep.subr.mxu0 %v368_v56  ;;  %809 = vmatprep.subr.mxu1 %v368_v56 }
  0xa4   : > { %462 = vmatpush2.msra.mxu0 %v367_v57  ;;  %841 = vmatpush2.msra.mxu1 %v367_v57 }
  0xa5   : > { %463 = vmatprep.subr.mxu0 %v366_v58  ;;  %810 = vmatprep.subr.mxu1 %v366_v58 }
  0xa6   : > { %464 = vmatpush2.msra.mxu0 %v365_v59  ;;  %842 = vmatpush2.msra.mxu1 %v365_v59 }
  0xa7   : > { %465 = vmatprep.subr.mxu0 %v364_v60  ;;  %811 = vmatprep.subr.mxu1 %v364_v60 }
  0xa8   : > { %466 = vmatpush2.msra.mxu0 %v363_v61  ;;  %843 = vmatpush2.msra.mxu1 %v363_v61 }
  0xa9   : > { %467 = vmatprep.subr.mxu0 %v362_v62  ;;  %812 = vmatprep.subr.mxu1 %v362_v62 }
  0xaa   : > { %468 = vmatpush2.msra.mxu0 %v361_v63  ;;  %844 = vmatpush2.msra.mxu1 %v361_v63 }
  0xab   : > { %469 = vmatprep.mubr.f32.mxu0 %v298_v0  ;;  %517 = vmatprep.mubr.f32.mxu1 %v314_v1 }
  0xac   : > { %470 = vmatmul.mubr.f32.vlgmr.msra.gmra.mxu0 %v297_v2  ;;  %518 = vmatmul.mubr.f32.vlgmr.msra.gmra.mxu1 %v313_v3 }
  0xad   : > { %475 = vmatprep.mubr.f32.mxu0 %v300_v4  ;;  %523 = vmatprep.mubr.f32.mxu1 %v316_v5 }
  0xb0   : > { %476 = vmatmul.mubr.f32.gmra.mxu0 %v299_v6  ;;  %524 = vmatmul.mubr.f32.gmra.mxu1 %v315_v7 }
  0xb1   : > { %481 = vmatprep.mubr.f32.mxu0 %v302_v8  ;;  %529 = vmatprep.mubr.f32.mxu1 %v318_v9 }
  0xb4   : > { %482 = vmatmul.mubr.f32.gmra.mxu0 %v301_v10  ;;  %530 = vmatmul.mubr.f32.gmra.mxu1 %v317_v11 }
  0xb5   : > { %487 = vmatprep.mubr.f32.mxu0 %v304_v12  ;;  %535 = vmatprep.mubr.f32.mxu1 %v320_v13 }
  0xb8   : > { %488 = vmatmul.mubr.f32.gmra.mxu0 %v303_v14  ;;  %536 = vmatmul.mubr.f32.gmra.mxu1 %v319_v15 }
  0xb9   : > { %493 = vmatprep.mubr.f32.mxu0 %v306_v16  ;;  %541 = vmatprep.mubr.f32.mxu1 %v322_v17 }
  0xbc   : > { %494 = vmatmul.mubr.f32.gmra.mxu0 %v305_v18  ;;  %542 = vmatmul.mubr.f32.gmra.mxu1 %v321_v19 }
  0xbd   : > { %499 = vmatprep.mubr.f32.mxu0 %v308_v20  ;;  %547 = vmatprep.mubr.f32.mxu1 %v324_v21 }
  0xc0   : > { %500 = vmatmul.mubr.f32.gmra.mxu0 %v307_v22  ;;  %548 = vmatmul.mubr.f32.gmra.mxu1 %v323_v23 }
  0xc1   : > { %505 = vmatprep.mubr.f32.mxu0 %v310_v24  ;;  %553 = vmatprep.mubr.f32.mxu1 %v326_v25 }
  0xc4   : > { %506 = vmatmul.mubr.f32.gmra.mxu0 %v309_v26  ;;  %554 = vmatmul.mubr.f32.gmra.mxu1 %v325_v27 }
  0xc5   : > { %511 = vmatprep.mubr.f32.mxu0 %v312_v28  ;;  %559 = vmatprep.mubr.f32.mxu1 %v328_v29 }
  0xc8   : > { %512 = vmatmul.mubr.f32.gmra.mxu0 %v311_v30  ;;  %560 = vmatmul.mubr.f32.gmra.mxu1 %v327_v31 }
 0x16c   : > { %v471_v39 = vpop.f32.mrf.mxu0  ;;  %v519_v40 = vpop.f32.mrf.mxu1 }
 0x16d   : > { %v472_v41 = vadd.f32 %v471_v39, %v1595_v37  ;;  %v520_v42 = vadd.f32 %v519_v40, %v1595_v37 }
 0x16e   : > { %v473_v43 = vpop.f32.mrf.mxu0  ;;  %v521_v44 = vpop.f32.mrf.mxu1 }
 0x16f   : > { %566 = vst [vmem:[%s1601_s12] sm:$0xff] %v472_v41  ;;  %582 = vst [vmem:[%s1601_s12 + $0x80] sm:$0xff] %v520_v42  ;;  %v474_v45 = vadd.f32 %v473_v43, %v1597_v38  ;;  %v522_v46 = vadd.f32 %v521_v44, %v1597_v38 }
 0x170   : > { %v477_v47 = vpop.f32.mrf.mxu0  ;;  %v525_v48 = vpop.f32.mrf.mxu1 }
 0x171   : > { %567 = vst [vmem:[%s1601_s12 + $0x8] sm:$0xff] %v474_v45  ;;  %583 = vst [vmem:[%s1601_s12 + $0x88] sm:$0xff] %v522_v46  ;;  %v478_v49 = vadd.f32 %v477_v47, %v1595_v37  ;;  %v526_v50 = vadd.f32 %v525_v48, %v1595_v37 }
 0x172   : > { %v479_v51 = vpop.f32.mrf.mxu0  ;;  %v527_v52 = vpop.f32.mrf.mxu1 }
 0x173   : > { %568 = vst [vmem:[%s1601_s12 + $0x10] sm:$0xff] %v478_v49  ;;  %584 = vst [vmem:[%s1601_s12 + $0x90] sm:$0xff] %v526_v50  ;;  %v480_v53 = vadd.f32 %v479_v51, %v1597_v38  ;;  %v528_v54 = vadd.f32 %v527_v52, %v1597_v38 }
 0x174   : > { %v483_v55 = vpop.f32.mrf.mxu0  ;;  %v531_v56 = vpop.f32.mrf.mxu1 }
 0x175   : > { %569 = vst [vmem:[%s1601_s12 + $0x18] sm:$0xff] %v480_v53  ;;  %585 = vst [vmem:[%s1601_s12 + $0x98] sm:$0xff] %v528_v54  ;;  %v484_v57 = vadd.f32 %v483_v55, %v1595_v37  ;;  %v532_v58 = vadd.f32 %v531_v56, %v1595_v37 }
 0x176   : > { %v485_v59 = vpop.f32.mrf.mxu0  ;;  %v533_v60 = vpop.f32.mrf.mxu1 }
 0x177   : > { %570 = vst [vmem:[%s1601_s12 + $0x20] sm:$0xff] %v484_v57  ;;  %586 = vst [vmem:[%s1601_s12 + $0xa0] sm:$0xff] %v532_v58  ;;  %v486_v61 = vadd.f32 %v485_v59, %v1597_v38  ;;  %v534_v62 = vadd.f32 %v533_v60, %v1597_v38 }
 0x178   : > { %v489_v63 = vpop.f32.mrf.mxu0  ;;  %v537_v0 = vpop.f32.mrf.mxu1 }
 0x179   : > { %571 = vst [vmem:[%s1601_s12 + $0x28] sm:$0xff] %v486_v61  ;;  %587 = vst [vmem:[%s1601_s12 + $0xa8] sm:$0xff] %v534_v62  ;;  %v490_v1 = vadd.f32 %v489_v63, %v1595_v37  ;;  %v538_v2 = vadd.f32 %v537_v0, %v1595_v37 }
 0x17a   : > { %v491_v3 = vpop.f32.mrf.mxu0  ;;  %v539_v4 = vpop.f32.mrf.mxu1 }
 0x17b   : > { %572 = vst [vmem:[%s1601_s12 + $0x30] sm:$0xff] %v490_v1  ;;  %588 = vst [vmem:[%s1601_s12 + $0xb0] sm:$0xff] %v538_v2  ;;  %v492_v5 = vadd.f32 %v491_v3, %v1597_v38  ;;  %v540_v6 = vadd.f32 %v539_v4, %v1597_v38 }
 0x17c   : > { %v495_v7 = vpop.f32.mrf.mxu0  ;;  %v543_v8 = vpop.f32.mrf.mxu1 }
 0x17d   : > { %573 = vst [vmem:[%s1601_s12 + $0x38] sm:$0xff] %v492_v5  ;;  %589 = vst [vmem:[%s1601_s12 + $0xb8] sm:$0xff] %v540_v6  ;;  %v496_v9 = vadd.f32 %v495_v7, %v1595_v37  ;;  %v544_v10 = vadd.f32 %v543_v8, %v1595_v37 }
 0x17e   : > { %v497_v11 = vpop.f32.mrf.mxu0  ;;  %v545_v12 = vpop.f32.mrf.mxu1 }
 0x17f   : > { %574 = vst [vmem:[%s1601_s12 + $0x40] sm:$0xff] %v496_v9  ;;  %590 = vst [vmem:[%s1601_s12 + $0xc0] sm:$0xff] %v544_v10  ;;  %v498_v13 = vadd.f32 %v497_v11, %v1597_v38  ;;  %v546_v14 = vadd.f32 %v545_v12, %v1597_v38 }
 0x180   : > { %v501_v15 = vpop.f32.mrf.mxu0  ;;  %v549_v16 = vpop.f32.mrf.mxu1 }
 0x181   : > { %575 = vst [vmem:[%s1601_s12 + $0x48] sm:$0xff] %v498_v13  ;;  %591 = vst [vmem:[%s1601_s12 + $0xc8] sm:$0xff] %v546_v14  ;;  %v502_v17 = vadd.f32 %v501_v15, %v1595_v37  ;;  %v550_v18 = vadd.f32 %v549_v16, %v1595_v37 }
 0x182   : > { %v503_v19 = vpop.f32.mrf.mxu0  ;;  %v551_v20 = vpop.f32.mrf.mxu1 }
 0x183   : > { %576 = vst [vmem:[%s1601_s12 + $0x50] sm:$0xff] %v502_v17  ;;  %592 = vst [vmem:[%s1601_s12 + $0xd0] sm:$0xff] %v550_v18  ;;  %v504_v21 = vadd.f32 %v503_v19, %v1597_v38  ;;  %v552_v22 = vadd.f32 %v551_v20, %v1597_v38 }
 0x184   : > { %v507_v23 = vpop.f32.mrf.mxu0  ;;  %v555_v24 = vpop.f32.mrf.mxu1 }
 0x185   : > { %577 = vst [vmem:[%s1601_s12 + $0x58] sm:$0xff] %v504_v21  ;;  %593 = vst [vmem:[%s1601_s12 + $0xd8] sm:$0xff] %v552_v22  ;;  %v508_v25 = vadd.f32 %v507_v23, %v1595_v37  ;;  %v556_v26 = vadd.f32 %v555_v24, %v1595_v37 }
 0x186   : > { %v509_v27 = vpop.f32.mrf.mxu0  ;;  %v557_v28 = vpop.f32.mrf.mxu1 }
 0x187   : > { %578 = vst [vmem:[%s1601_s12 + $0x60] sm:$0xff] %v508_v25  ;;  %594 = vst [vmem:[%s1601_s12 + $0xe0] sm:$0xff] %v556_v26  ;;  %v510_v29 = vadd.f32 %v509_v27, %v1597_v38  ;;  %v558_v30 = vadd.f32 %v557_v28, %v1597_v38 }
 0x188   : > { %v513_v31 = vpop.f32.mrf.mxu0  ;;  %v561_v32 = vpop.f32.mrf.mxu1 }
 0x189   : > { %579 = vst [vmem:[%s1601_s12 + $0x68] sm:$0xff] %v510_v29  ;;  %595 = vst [vmem:[%s1601_s12 + $0xe8] sm:$0xff] %v558_v30  ;;  %v514_v33 = vadd.f32 %v513_v31, %v1595_v37  ;;  %v562_v34 = vadd.f32 %v561_v32, %v1595_v37 }
 0x18a   : > { %v515_v35 = vpop.f32.mrf.mxu0  ;;  %v563_v36 = vpop.f32.mrf.mxu1 }
 0x18b   : > { %580 = vst [vmem:[%s1601_s12 + $0x70] sm:$0xff] %v514_v33  ;;  %596 = vst [vmem:[%s1601_s12 + $0xf0] sm:$0xff] %v562_v34  ;;  %v516_v39 = vadd.f32 %v515_v35, %v1597_v38  ;;  %v564_v40 = vadd.f32 %v563_v36, %v1597_v38 }
 0x18d   : > { %581 = vst [vmem:[%s1601_s12 + $0x78] sm:$0xff] %v516_v39  ;;  %597 = vst [vmem:[%s1601_s12 + $0xf8] sm:$0xff] %v564_v40 }
 0x18e   : > { %1085 = shalt.err (!%p1082_p8)
}
 0x18f   : > { %s1086_s4 = scalar_lea.hbm %s1665_s21, 4096  ;;  %s1090_s12 = scalar_lea.hbm %s1799_s28, 24576 }
 0x190   : > { %p1087_p7 = scmp.ne.s32.totalorder %s1665_s21, %s1086_s4  ;;  %p1091_p12 = scmp.lt.s32.totalorder %s1665_s21, %s1799_s28 }
 0x191   : > { %p1092_p4 = scmp.lt.s32.totalorder %s1090_s12, %s1086_s4 }
 0x192   : > { %p1088_p11 = pnand %p1087_p7, %p1800_p10 }
 0x193   : > { %p1093_p2 = por %p1092_p4, %p1091_p12 }
 0x194   : > { %p1089_p5 = pneg %p1088_p11 }
 0x196   : > { %p1094_p6 = pnand %p1093_p2, %p1089_p5 }
 0x198   : > { %1097 = shalt.err (!%p1094_p6)
}
 0x199   : > { %s1229_s8 = smov 256   ;;  %s1230_s5 = smov 768  }
 0x19a   : > { %s1231_s22 = smov 16  }
 0x19b   : > { %852 = dma.vmem_to_hbm [thread:$0]  (%p1800_p10), %s1667_s10, 4096, %s1665_s21, %s1677_s11, %s1229_s8, %s1230_s5, %s1231_s22  }
 0x19c PF: > { %s1801_s26 = sld [smem:[#allocation12_spill]]  ;;  %p869_p1 = scmp.ge.s32.totalorder %s1220_s25, 2 }
 0x19d   : > { %s1802_s3 = sld [smem:[#allocation22_spill]] }
 0x1a2   : > { %s632_s20 = sand.u32 1, %s1801_s26  }
 0x1a3   : > { %p1803_p9 = scmp.ne.s32.totalorder %s1802_s3, 0  ;;  %s633_s15 = scalar_lea.sflag [#allocation4], %s632_s20 }
 0x1a5   : > { %p865_p3 = pnand %p869_p1, %p1803_p9 }
 0x1a7   : > { %p866_p0 = pneg %p865_p3 }
 0x1a9   : > { %1163 = dma.done.wait (%p866_p0), %s633_s15, 4096  }
 0x1aa   : > { %1165 = vsyncadd (%p866_p0), %s633_s15, 4294963200  ;;  %s22_s25 = sadd.s32 1, %s1220_s25   ;;  %s1805_s6 = sld [smem:[#allocation13_spill]] }
 0x1ab   : > { %p1705_p13 = scmp.ge.s32.totalorder %s22_s25, 8   ;;  %s1806_s14 = sld [smem:[#allocation21_spill]] }
 0x1ac   : > { %s1807_s10 = sld [smem:[#allocation19_spill]]  ;;  %s1812_s12 = smov %s1172_s13 }
 0x1ad   : > { %s1808_s21 = sld [smem:[#allocation14_spill]]  ;;  %s1814_s15 = smov %s1184_s16 }
 0x1ae   : > { %s1809_s20 = sld [smem:[#allocation20_spill]]  ;;  %s1815_s16 = smov %s1188_s17 }
 0x1af   : > { %s1810_s11 = sld [smem:[#allocation17_spill]]  ;;  %s1817_s18 = smov %s1196_s19 }
 0x1b0   : > { %s1811_s7 = sld [smem:[#allocation18_spill]]  ;;  %s1813_s13 = smov %s1805_s6 }
 0x1b1   : > { %s1820_s22 = smov %s1216_s24 }
 0x1b2   : > { %s1816_s17 = smov %s1807_s10  ;;  %21 = sbr.rel (!%p1705_p13) target bundleno = 15 (0xf), region = 101 }
 0x1b3   : > { %s1818_s19 = smov %s1808_s21  ;;  %s1819_s21 = smov %s1212_s23 }
 0x1b5   : > { %s1821_s23 = smov %s1810_s11 }
 0x1b6   : > { %s1822_s24 = smov %s1811_s7 }
 0x1b7   :  { %638 = vsyncpa [#allocation3], 1 }
 0x1b8   :  { %640 = vsyncpa [#allocation3 + $0x1], 1 }
 0x1b9   :  { %641 = vsyncpa [#allocation6], 1 }
 0x1ba   :  { %643 = vsyncpa [#allocation6 + $0x1], 1 }
 0x1bb   :  { %644 = vsyncpa [#allocation4], 1 }
 0x1bc   :  { %646 = vsyncpa [#allocation4 + $0x1], 1 }

</bundles_post_ra>
